<compile_context>
chip_gen: v7x
topology: tpu7x:2x2x1
jax: 0.10.0
libtpu: 0.0.40
codegen_flags: <defaults>
</compile_context>

<pallas_src>
import functools

import numpy as np
import jax
import jax.numpy as jnp
from jax.experimental import pallas as pl
from jax.experimental.pallas import tpu as pltpu

EPS = 1e-5  # torch.nn.BatchNorm2d default eps


def _ortho_dft(n):
    """Symmetric ortho DFT matrix F[j,k] = exp(-2i*pi*j*k/n)/sqrt(n)."""
    k = np.arange(n)
    return np.exp(-2j * np.pi * np.outer(k, k) / n) / np.sqrt(n)


def fourier_unit_kernel(x2_ref, kf_ref, ki_ref, wbig_ref, g_ref,
                        gamma_ref, beta_ref, out_ref):
    """Fused FourierUnit forward.

    x2_ref   : (C*B, H*W)        input, rows (c, b), spatial flattened minor
    kf_ref   : (H*W, 2*H*W)      fused forward 2-D DFT  [A_r | A_i]
    ki_ref   : (2*H*W, H*W)      fused inverse 2-D DFT  [[A_r], [A_i]]
    wbig_ref : (2*Co*B, 2*C*B)   kron(conv_weight, I_B)  (block-diagonal in b)
    g_ref    : (2*Co*B, 2*Co*B)  kron(I_{2Co}, ones(B,B)) / (B*H*W)  (BN stats)
    gamma_ref, beta_ref : (2*Co*B, 1)  per-row BN affine params
    out_ref  : (Co*B, H*W)       real ifft2 output, rows (o, b)
    """
    f32 = jnp.float32
    dot = functools.partial(jnp.dot, preferred_element_type=f32)
    hw = kf_ref.shape[0]

    # 1) fft2 (ortho): one wide MXU matmul.  cols [0:HW) = Re, [HW:2HW) = Im.
    spec = dot(x2_ref[...], kf_ref[...])                      # (C*B, 2*HW)

    # 2) stack Re rows above Im rows -> contraction layout rows (reim, c, b).
    #    Both lane slices are 128-aligned; the concat is a cheap aligned copy.
    sstack = jnp.concatenate([spec[:, :hw], spec[:, hw:]], axis=0)   # (2*C*B, HW)

    # 3) 1x1 conv (no bias) over the 2C stacked channels, all batches at once.
    y = dot(wbig_ref[...], sstack)                            # (2*Co*B, HW), rows (o, b)

    # 4) BatchNorm2d (training-mode batch stats over (b, u, v)) + ReLU.
    g = g_ref[...]
    mu = jnp.sum(dot(g, y), axis=1, keepdims=True)            # per-row channel mean
    d = y - mu
    var = jnp.sum(dot(g, d * d), axis=1, keepdims=True)       # biased variance
    y = d * jax.lax.rsqrt(var + EPS)
    y = jnp.maximum(y * gamma_ref[...] + beta_ref[...], 0.0)

    # 5) ifft2 (ortho), real part:  [Yr | Yi] @ [[A_r],[A_i]], all channels at once.
    half = y.shape[0] // 2                                    # Co*B
    p = jnp.concatenate([y[:half, :], y[half:, :]], axis=1)   # (Co*B, 2*HW)
    out_ref[...] = dot(p, ki_ref[...])                        # (Co*B, HW)


def fourier_unit(x, wt, gamma, beta):
    """x: (B, C, H, W) f32; wt: (2*Co, 2*C) f32; gamma/beta: (2*Co,) f32."""
    B, C, H, W = x.shape
    Co = wt.shape[0] // 2
    HW = H * W

    # ---- host-side constants (data independent) ----
    # Kronecker 2-D ortho DFT: A[(h,w),(u,v)] = F_H[h,u] * F_W[w,v]; symmetric.
    A = np.kron(_ortho_dft(H), _ortho_dft(W))
    a_r = np.real(A).astype(np.float32)
    a_i = np.imag(A).astype(np.float32)
    kf = jnp.asarray(np.concatenate([a_r, a_i], axis=1))      # (HW, 2*HW)
    ki = jnp.asarray(np.concatenate([a_r, a_i], axis=0))      # (2*HW, HW)
    # BN stat aggregator: averages the B rows of each channel; the lane
    # reduction inside the kernel finishes the mean over H*W frequency bins.
    g = jnp.asarray(np.kron(np.eye(2 * Co, dtype=np.float32),
                            np.ones((B, B), dtype=np.float32)) / (B * HW))

    # ---- parameter-dependent operands (cheap layout plumbing, done in XLA) ----
    w_big = jnp.kron(wt.astype(jnp.float32), jnp.eye(B, dtype=jnp.float32))
    gamma_rows = jnp.repeat(gamma, B).reshape(2 * Co * B, 1)
    beta_rows = jnp.repeat(beta, B).reshape(2 * Co * B, 1)

    # rows (c, b), spatial flattened minor -> wide, lane-dense matmuls.
    x2 = jnp.transpose(x, (1, 0, 2, 3)).reshape(C * B, HW)

    vmem = pl.BlockSpec(memory_space=pltpu.MemorySpace.VMEM)
    out2 = pl.pallas_call(
        fourier_unit_kernel,
        out_shape=jax.ShapeDtypeStruct((Co * B, HW), jnp.float32),
        in_specs=[vmem] * 7,
        out_specs=vmem,
        compiler_params=pltpu.CompilerParams(
            vmem_limit_bytes=32 * 1024 * 1024),
    )(x2, kf, ki, w_big, g, gamma_rows, beta_rows)

    # lane-dense kernel output -> NCHW in the wrapper.
    return jnp.transpose(out2.reshape(Co, B, H, W), (1, 0, 2, 3))


def fourier_unit_ref(x, wt, gamma, beta):
    # Pure-JAX reference mirroring the PyTorch forward (training-mode BN).
    f = jnp.fft.fft2(x, norm="ortho")
    ff = jnp.concatenate([f.real, f.imag], axis=1)
    y = jnp.einsum("oc,bchw->bohw", wt, ff)
    mu = jnp.mean(y, axis=(0, 2, 3), keepdims=True)
    var = jnp.mean((y - mu) ** 2, axis=(0, 2, 3), keepdims=True)
    y = (y - mu) / jnp.sqrt(var + EPS)
    y = y * gamma.reshape(1, -1, 1, 1) + beta.reshape(1, -1, 1, 1)
    y = jnp.maximum(y, 0.0)
    yr, yi = jnp.split(y, 2, axis=1)
    return jnp.fft.ifft2(yr + 1j * yi, norm="ortho").real


if __name__ == "__main__":
    B, Cin, Cout, H, W = 2, 4, 4, 16, 16
    key = jax.random.PRNGKey(0)
    kx, kw, kg, kb = jax.random.split(key, 4)

    x = jax.random.normal(kx, (B, Cin, H, W), dtype=jnp.float32)
    # Conv2d(2*Cin -> 2*Cout, k=1, bias=False) weight, squeezed to (2Co, 2Ci).
    wt = jax.random.normal(kw, (2 * Cout, 2 * Cin), dtype=jnp.float32) * (
        1.0 / np.sqrt(2 * Cin))
    # BatchNorm2d affine params (deterministic, non-trivial).
    gamma = 1.0 + 0.1 * jax.random.normal(kg, (2 * Cout,), dtype=jnp.float32)
    beta = 0.05 * jax.random.normal(kb, (2 * Cout,), dtype=jnp.float32)

    out = jax.block_until_ready(fourier_unit(x, wt, gamma, beta))
    ref = jax.block_until_ready(fourier_unit_ref(x, wt, gamma, beta))
    np.testing.assert_allclose(np.asarray(out), np.asarray(ref),
                               rtol=2e-2, atol=2e-2)
    print("KERNEL_OK")
</pallas_src>

<mosaic_0001>
module attributes {stable_mosaic.version = 11 : i64} {
  func.func @fourier_unit_kernel(%arg0: memref<8x256xf32, #tpu.memory_space<vmem>>, %arg1: memref<256x512xf32, #tpu.memory_space<vmem>>, %arg2: memref<512x256xf32, #tpu.memory_space<vmem>>, %arg3: memref<16x16xf32, #tpu.memory_space<vmem>>, %arg4: memref<16x16xf32, #tpu.memory_space<vmem>>, %arg5: memref<16x1xf32, #tpu.memory_space<vmem>>, %arg6: memref<16x1xf32, #tpu.memory_space<vmem>>, %arg7: memref<8x256xf32, #tpu.memory_space<vmem>>) attributes {dimension_semantics = [], scalar_prefetch = 0 : i64, scratch_operands = 0 : i64, tpu.core_type = #tpu.core_type<tc>} {
    %c0 = arith.constant 0 : index
    %c0_0 = arith.constant 0 : index
    %0 = vector.load %arg0[%c0, %c0_0] : memref<8x256xf32, #tpu.memory_space<vmem>>, vector<8x256xf32>
    %c0_1 = arith.constant 0 : index
    %c0_2 = arith.constant 0 : index
    %1 = vector.load %arg1[%c0_1, %c0_2] : memref<256x512xf32, #tpu.memory_space<vmem>>, vector<256x512xf32>
    %cst = arith.constant dense<0.000000e+00> : vector<8x512xf32>
    %2 = tpu.matmul %0, %1, %cst {dimension_numbers = #tpu.dot_dimension_numbers<[1], [0], [0], [1], [0, 0, 1, 1], [], []>} : vector<8x256xf32>, vector<256x512xf32>, vector<8x512xf32> -> vector<8x512xf32>
    %3 = vector.extract_strided_slice %2 {offsets = [0, 0], sizes = [8, 256], strides = [1, 1]} : vector<8x512xf32> to vector<8x256xf32>
    %4 = vector.extract_strided_slice %2 {offsets = [0, 256], sizes = [8, 256], strides = [1, 1]} : vector<8x512xf32> to vector<8x256xf32>
    %5 = tpu.concatenate %3, %4 in 0 : vector<8x256xf32>, vector<8x256xf32> -> vector<16x256xf32>
    %c0_3 = arith.constant 0 : index
    %c0_4 = arith.constant 0 : index
    %6 = vector.load %arg3[%c0_3, %c0_4] : memref<16x16xf32, #tpu.memory_space<vmem>>, vector<16x16xf32>
    %cst_5 = arith.constant dense<0.000000e+00> : vector<16x256xf32>
    %7 = tpu.matmul %6, %5, %cst_5 {dimension_numbers = #tpu.dot_dimension_numbers<[1], [0], [0], [1], [0, 0, 1, 1], [], []>} : vector<16x16xf32>, vector<16x256xf32>, vector<16x256xf32> -> vector<16x256xf32>
    %c0_6 = arith.constant 0 : index
    %c0_7 = arith.constant 0 : index
    %8 = vector.load %arg4[%c0_6, %c0_7] : memref<16x16xf32, #tpu.memory_space<vmem>>, vector<16x16xf32>
    %cst_8 = arith.constant dense<0.000000e+00> : vector<16x256xf32>
    %9 = tpu.matmul %8, %7, %cst_8 {dimension_numbers = #tpu.dot_dimension_numbers<[1], [0], [0], [1], [0, 0, 1, 1], [], []>} : vector<16x16xf32>, vector<16x256xf32>, vector<16x256xf32> -> vector<16x256xf32>
    %cst_9 = arith.constant dense<0.000000e+00> : vector<16xf32>
    %10 = vector.multi_reduction <add>, %9, %cst_9 [1] : vector<16x256xf32> to vector<16xf32>
    %11 = vector.shape_cast %10 : vector<16xf32> to vector<16x1xf32>
    %12 = vector.broadcast %11 : vector<16x1xf32> to vector<16x256xf32>
    %13 = arith.subf %7, %12 : vector<16x256xf32>
    %14 = arith.mulf %13, %13 : vector<16x256xf32>
    %cst_10 = arith.constant dense<0.000000e+00> : vector<16x256xf32>
    %15 = tpu.matmul %8, %14, %cst_10 {dimension_numbers = #tpu.dot_dimension_numbers<[1], [0], [0], [1], [0, 0, 1, 1], [], []>} : vector<16x16xf32>, vector<16x256xf32>, vector<16x256xf32> -> vector<16x256xf32>
    %cst_11 = arith.constant dense<0.000000e+00> : vector<16xf32>
    %16 = vector.multi_reduction <add>, %15, %cst_11 [1] : vector<16x256xf32> to vector<16xf32>
    %17 = vector.shape_cast %16 : vector<16xf32> to vector<16x1xf32>
    %cst_12 = arith.constant 9.99999974E-6 : f32
    %18 = vector.broadcast %cst_12 : f32 to vector<16x1xf32>
    %19 = arith.addf %17, %18 : vector<16x1xf32>
    %20 = math.rsqrt %19 : vector<16x1xf32>
    %21 = vector.broadcast %20 : vector<16x1xf32> to vector<16x256xf32>
    %22 = arith.mulf %13, %21 : vector<16x256xf32>
    %c0_13 = arith.constant 0 : index
    %c0_14 = arith.constant 0 : index
    %23 = vector.load %arg5[%c0_13, %c0_14] : memref<16x1xf32, #tpu.memory_space<vmem>>, vector<16x1xf32>
    %24 = vector.broadcast %23 : vector<16x1xf32> to vector<16x256xf32>
    %25 = arith.mulf %22, %24 : vector<16x256xf32>
    %c0_15 = arith.constant 0 : index
    %c0_16 = arith.constant 0 : index
    %26 = vector.load %arg6[%c0_15, %c0_16] : memref<16x1xf32, #tpu.memory_space<vmem>>, vector<16x1xf32>
    %27 = vector.broadcast %26 : vector<16x1xf32> to vector<16x256xf32>
    %28 = arith.addf %25, %27 : vector<16x256xf32>
    %cst_17 = arith.constant 0.000000e+00 : f32
    %29 = vector.broadcast %cst_17 : f32 to vector<16x256xf32>
    %30 = arith.maximumf %28, %29 : vector<16x256xf32>
    %31 = vector.extract_strided_slice %30 {offsets = [0, 0], sizes = [8, 256], strides = [1, 1]} : vector<16x256xf32> to vector<8x256xf32>
    %32 = vector.extract_strided_slice %30 {offsets = [8, 0], sizes = [8, 256], strides = [1, 1]} : vector<16x256xf32> to vector<8x256xf32>
    %33 = tpu.concatenate %31, %32 in 1 : vector<8x256xf32>, vector<8x256xf32> -> vector<8x512xf32>
    %c0_18 = arith.constant 0 : index
    %c0_19 = arith.constant 0 : index
    %34 = vector.load %arg2[%c0_18, %c0_19] : memref<512x256xf32, #tpu.memory_space<vmem>>, vector<512x256xf32>
    %cst_20 = arith.constant dense<0.000000e+00> : vector<8x256xf32>
    %35 = tpu.matmul %33, %34, %cst_20 {dimension_numbers = #tpu.dot_dimension_numbers<[1], [0], [0], [1], [0, 0, 1, 1], [], []>} : vector<8x512xf32>, vector<512x256xf32>, vector<8x256xf32> -> vector<8x256xf32>
    %c0_21 = arith.constant 0 : index
    %c0_22 = arith.constant 0 : index
    %36 = vector.load %arg7[%c0_21, %c0_22] : memref<8x256xf32, #tpu.memory_space<vmem>>, vector<8x256xf32>
    tpu.vector_store %arg7[%c0_21, %c0_22], %35 {strides = array<i32>} : memref<8x256xf32, #tpu.memory_space<vmem>>, vector<8x256xf32>,
    return
  }
}

</mosaic_0001>

<bundles_post_ra>
// kernel: tpu_custom_call.1
= control target key start
LH: loop header
LB: loop body
LE: loop exit
PB: predicated region body
PF: predicated region fallthrough
CT: control target
= control target key end

     0   :  { %12 = vsyncpa [#allocation3], 0  ;;  %s1439_s0 = inlined_call_operand.vmem [shape: f32[8,256], index: 0, kind: input, shape index: {}]   ;;  %s1440_s1 = inlined_call_operand.hbm [shape: f32[256,512], index: 1, kind: input, shape index: {}]   ;;  %s1441_s2 = inlined_call_operand.hbm [shape: f32[512,256], index: 2, kind: input, shape index: {}]   ;;  %s1442_s3 = inlined_call_operand.vmem [shape: f32[16,16], index: 3, kind: input, shape index: {}]   ;;  %s1443_s4 = inlined_call_operand.vmem [shape: f32[16,16], index: 4, kind: input, shape index: {}]   ;;  %s1444_s5 = inlined_call_operand.vmem [shape: f32[16,1], index: 5, kind: input, shape index: {}]   ;;  %s1445_s6 = inlined_call_operand.vmem [shape: f32[16,1], index: 6, kind: input, shape index: {}]   ;;  %s1446_s7 = inlined_call_operand.hbm [shape: f32[8,256], index: 7, kind: output, shape index: {}]  }
   0x1   :  { %13 = vsyncpa [#allocation6], 0 }
   0x2   :  { %14 = vsyncpa [#allocation4], 0  ;;  %s1292_s24 = smov [#allocation2]   ;;  %s1220_s28 = scalar_lea.hbm %s1440_s1, 16384 }
   0x3   :  { %s22_s25 = sshll.u32 %s1292_s24, 4  ;;  %p1221_p0 = scmp.ne.s32.totalorder %s1440_s1, %s1220_s28  ;;  %s23_s25 = int_to_ptr.vmem [resolvable:$true] %s22_s25 }
   0x4   :  { %p1224_p1 = scmp.lt.u32.totalorder %s1220_s28, %s1440_s1 }
   0x6   :  { %p1226_p2 = pnand %p1224_p1, %p1221_p0 }
   0x8   :  { %1229 = shalt.err (!%p1226_p2)
}
   0x9   :  { %s1230_s10 = scalar_lea.vmem %s23_s25, 16384  ;;  %p1235_p4 = scmp.lt.s32.totalorder %s23_s25, %s23_s25 }
   0xa   :  { %p1231_p3 = scmp.ne.s32.totalorder %s23_s25, %s1230_s10  ;;  %p1236_p5 = scmp.lt.s32.totalorder %s1230_s10, %s1230_s10 }
   0xc   :  { %p1237_p6 = por %p1236_p5, %p1235_p4 }
   0xe   :  { %p1238_p7 = pnand %p1237_p6, %p1231_p3 }
  0x10   :  { %1241 = shalt.err (!%p1238_p7)
}
  0x11   :  { %s1293_s11 = smov 512   ;;  %s1294_s12 = smov 32  }
  0x12   :  { %28 = dma.hbm_to_vmem [thread:$0]  %s1440_s1, 16384, %s23_s25, [#allocation3], %s1293_s11, %s1293_s11, %s1294_s12  }
  0x13   :  { %s1295_s15 = smov [#allocation5]   ;;  %s1242_s19 = scalar_lea.hbm %s1441_s2, 16384 }
  0x14   :  { %s34_s16 = sshll.u32 %s1295_s15, 4  ;;  %p1243_p8 = scmp.ne.s32.totalorder %s1441_s2, %s1242_s19  ;;  %s35_s16 = int_to_ptr.vmem [resolvable:$true] %s34_s16 }
  0x15   :  { %p1246_p9 = scmp.lt.u32.totalorder %s1242_s19, %s1441_s2 }
  0x17   :  { %p1248_p10 = pnand %p1246_p9, %p1243_p8 }
  0x19   :  { %1251 = shalt.err (!%p1248_p10)
}
  0x1a   :  { %s1252_s24 = scalar_lea.vmem %s35_s16, 16384  ;;  %p1257_p12 = scmp.lt.s32.totalorder %s35_s16, %s35_s16 }
  0x1b   :  { %p1253_p11 = scmp.ne.s32.totalorder %s35_s16, %s1252_s24  ;;  %p1258_p13 = scmp.lt.s32.totalorder %s1252_s24, %s1252_s24 }
  0x1d   :  { %p1259_p0 = por %p1258_p13, %p1257_p12 }
  0x1f   :  { %p1260_p1 = pnand %p1259_p0, %p1253_p11 }
  0x21   :  { %1263 = shalt.err (!%p1260_p1)
}
  0x22   :  { %s1296_s1 = smov 256   ;;  %s1297_s25 = smov 16  }
  0x23   :  { %40 = dma.hbm_to_vmem [thread:$0]  %s1441_s2, 16384, %s35_s16, [#allocation6], %s1296_s1, %s1296_s1, %s1297_s25  }
  0x24   :  { %1286 = dma.done.wait [#allocation3], 16384  }
  0x25   :  { %1287 = vsyncadd [#allocation3], 4294950912 }
  0x26   :  { %1288 = dma.done.wait [#allocation6], 16384  }
  0x27   :  { %1289 = vsyncadd [#allocation6], 4294950912  ;;  %v58_v0 = vld [vmem:[#allocation2 + $0x8] sm:$0xff]  ;;  %v60_v2 = vld [vmem:[#allocation2 + $0x18] sm:$0xff]  ;;  %vm329_vm0 = vcmask 130048  }
  0x28   :  { %v62_v1 = vld [vmem:[#allocation2 + $0x28] sm:$0xff]  ;;  %v64_v4 = vld [vmem:[#allocation2 + $0x38] sm:$0xff]  ;;  %v57_v5 = vld [vmem:[#allocation2] sm:$0xff] }
  0x29   :  { %v933_v3 = vpack.c.bf16 %v62_v1, %v58_v0  ;;  %v61_v6 = vld [vmem:[#allocation2 + $0x20] sm:$0xff]  ;;  %v997_v7 = vpack.c.bf16 %v64_v4, %v60_v2  ;;  %v59_v9 = vld [vmem:[#allocation2 + $0x10] sm:$0xff]  ;;  %v66_v11 = vld [vmem:[#allocation2 + $0x48] sm:$0xff] }
  0x2a   :  { %v935_v8 = vpack.c.bf16 %v61_v6, %v57_v5  ;;  %v63_v10 = vld [vmem:[#allocation2 + $0x30] sm:$0xff]  ;;  %v70_v13 = vld [vmem:[#allocation2 + $0x68] sm:$0xff]  ;;  %v68_v14 = vld [vmem:[#allocation2 + $0x58] sm:$0xff] }
  0x2b   :  { %934 = vmatprep.subr.bf16.mxu0 %v933_v3  ;;  %v999_v12 = vpack.c.bf16 %v63_v10, %v59_v9  ;;  %v72_v15 = vld [vmem:[#allocation2 + $0x78] sm:$0xff]  ;;  %998 = vmatprep.subr.bf16.mxu1 %v997_v7  ;;  %v937_v16 = vpack.c.bf16 %v70_v13, %v66_v11  ;;  %v65_v18 = vld [vmem:[#allocation2 + $0x40] sm:$0xff]  ;;  %v67_v20 = vld [vmem:[#allocation2 + $0x50] sm:$0xff] }
  0x2c   :  { %936 = vmatpush1.bf16.msra.mxu0 %v935_v8  ;;  %v1001_v17 = vpack.c.bf16 %v72_v15, %v68_v14  ;;  %v69_v19 = vld [vmem:[#allocation2 + $0x60] sm:$0xff]  ;;  %v71_v22 = vld [vmem:[#allocation2 + $0x70] sm:$0xff]  ;;  %v74_v23 = vld [vmem:[#allocation2 + $0x88] sm:$0xff] }
  0x2d   :  { %1000 = vmatpush1.bf16.msra.mxu1 %v999_v12  ;;  %v939_v21 = vpack.c.bf16 %v69_v19, %v65_v18  ;;  %v78_v24 = vld [vmem:[#allocation2 + $0xa8] sm:$0xff]  ;;  %938 = vmatprep.subr.bf16.mxu0 %v937_v16  ;;  %v1003_v25 = vpack.c.bf16 %v71_v22, %v67_v20  ;;  %v76_v27 = vld [vmem:[#allocation2 + $0x98] sm:$0xff]  ;;  %v73_v29 = vld [vmem:[#allocation2 + $0x80] sm:$0xff] }
  0x2e   :  { %1002 = vmatprep.subr.bf16.mxu1 %v1001_v17  ;;  %v941_v26 = vpack.c.bf16 %v78_v24, %v74_v23  ;;  %v80_v28 = vld [vmem:[#allocation2 + $0xb8] sm:$0xff]  ;;  %v77_v31 = vld [vmem:[#allocation2 + $0xa0] sm:$0xff]  ;;  %v75_v32 = vld [vmem:[#allocation2 + $0x90] sm:$0xff] }
  0x2f   :  { %v1005_v30 = vpack.c.bf16 %v80_v28, %v76_v27  ;;  %v79_v33 = vld [vmem:[#allocation2 + $0xb0] sm:$0xff]  ;;  %v943_v34 = vpack.c.bf16 %v77_v31, %v73_v29  ;;  %v82_v35 = vld [vmem:[#allocation2 + $0xc8] sm:$0xff]  ;;  %v84_v37 = vld [vmem:[#allocation2 + $0xd8] sm:$0xff] }
  0x30   :  { %940 = vmatpush1.bf16.msra.mxu0 %v939_v21  ;;  %v86_v36 = vld [vmem:[#allocation2 + $0xe8] sm:$0xff]  ;;  %v1007_v38 = vpack.c.bf16 %v79_v33, %v75_v32  ;;  %v88_v40 = vld [vmem:[#allocation2 + $0xf8] sm:$0xff]  ;;  %v81_v41 = vld [vmem:[#allocation2 + $0xc0] sm:$0xff] }
  0x31   :  { %1004 = vmatpush1.bf16.msra.mxu1 %v1003_v25  ;;  %942 = vmatprep.subr.bf16.mxu0 %v941_v26  ;;  %v945_v39 = vpack.c.bf16 %v86_v36, %v82_v35  ;;  %v85_v42 = vld [vmem:[#allocation2 + $0xe0] sm:$0xff]  ;;  %v1009_v43 = vpack.c.bf16 %v88_v40, %v84_v37  ;;  %v83_v44 = vld [vmem:[#allocation2 + $0xd0] sm:$0xff]  ;;  %v90_v46 = vld [vmem:[#allocation2 + $0x108] sm:$0xff] }
  0x32   :  { %1006 = vmatprep.subr.bf16.mxu1 %v1005_v30  ;;  %v87_v45 = vld [vmem:[#allocation2 + $0xf0] sm:$0xff]  ;;  %v94_v47 = vld [vmem:[#allocation2 + $0x128] sm:$0xff]  ;;  %v92_v48 = vld [vmem:[#allocation2 + $0x118] sm:$0xff]  ;;  %v947_v50 = vpack.c.bf16 %v85_v42, %v81_v41 }
  0x33   :  { %v96_v49 = vld [vmem:[#allocation2 + $0x138] sm:$0xff]  ;;  %v1011_v51 = vpack.c.bf16 %v87_v45, %v83_v44  ;;  %v949_v52 = vpack.c.bf16 %v94_v47, %v90_v46  ;;  %v89_v53 = vld [vmem:[#allocation2 + $0x100] sm:$0xff]  ;;  %v91_v55 = vld [vmem:[#allocation2 + $0x110] sm:$0xff] }
  0x34   :  { %944 = vmatpush1.bf16.msra.mxu0 %v943_v34  ;;  %v93_v54 = vld [vmem:[#allocation2 + $0x120] sm:$0xff]  ;;  %v1013_v56 = vpack.c.bf16 %v96_v49, %v92_v48  ;;  %v95_v57 = vld [vmem:[#allocation2 + $0x130] sm:$0xff]  ;;  %v98_v58 = vld [vmem:[#allocation2 + $0x148] sm:$0xff] }
  0x35   :  { %1008 = vmatpush1.bf16.msra.mxu1 %v1007_v38  ;;  %946 = vmatprep.subr.bf16.mxu0 %v945_v39  ;;  %v102_v59 = vld [vmem:[#allocation2 + $0x168] sm:$0xff]  ;;  %v100_v60 = vld [vmem:[#allocation2 + $0x158] sm:$0xff]  ;;  %v951_v62 = vpack.c.bf16 %v93_v54, %v89_v53  ;;  %v1015_v63 = vpack.c.bf16 %v95_v57, %v91_v55  ;;  %v97_v1 = vld [vmem:[#allocation2 + $0x140] sm:$0xff] }
  0x36   :  { %1010 = vmatprep.subr.bf16.mxu1 %v1009_v43  ;;  %v104_v61 = vld [vmem:[#allocation2 + $0x178] sm:$0xff]  ;;  %v953_v0 = vpack.c.bf16 %v102_v59, %v98_v58  ;;  %v101_v2 = vld [vmem:[#allocation2 + $0x160] sm:$0xff]  ;;  %v99_v3 = vld [vmem:[#allocation2 + $0x150] sm:$0xff] }
  0x37   :  { %v1017_v4 = vpack.c.bf16 %v104_v61, %v100_v60  ;;  %v103_v5 = vld [vmem:[#allocation2 + $0x170] sm:$0xff]  ;;  %v106_v6 = vld [vmem:[#allocation2 + $0x188] sm:$0xff]  ;;  %v108_v8 = vld [vmem:[#allocation2 + $0x198] sm:$0xff]  ;;  %v955_v10 = vpack.c.bf16 %v101_v2, %v97_v1 }
  0x38   :  { %948 = vmatpush1.bf16.msra.mxu0 %v947_v50  ;;  %v110_v7 = vld [vmem:[#allocation2 + $0x1a8] sm:$0xff]  ;;  %v112_v9 = vld [vmem:[#allocation2 + $0x1b8] sm:$0xff]  ;;  %v1019_v11 = vpack.c.bf16 %v103_v5, %v99_v3  ;;  %v105_v13 = vld [vmem:[#allocation2 + $0x180] sm:$0xff] }
  0x39   :  { %1012 = vmatpush1.bf16.msra.mxu1 %v1011_v51  ;;  %950 = vmatprep.subr.bf16.mxu0 %v949_v52  ;;  %v957_v12 = vpack.c.bf16 %v110_v7, %v106_v6  ;;  %v109_v14 = vld [vmem:[#allocation2 + $0x1a0] sm:$0xff]  ;;  %v107_v15 = vld [vmem:[#allocation2 + $0x190] sm:$0xff]  ;;  %v1021_v16 = vpack.c.bf16 %v112_v9, %v108_v8  ;;  %v114_v18 = vld [vmem:[#allocation2 + $0x1c8] sm:$0xff] }
  0x3a   :  { %1014 = vmatprep.subr.bf16.mxu1 %v1013_v56  ;;  %v111_v17 = vld [vmem:[#allocation2 + $0x1b0] sm:$0xff]  ;;  %v118_v19 = vld [vmem:[#allocation2 + $0x1e8] sm:$0xff]  ;;  %v116_v20 = vld [vmem:[#allocation2 + $0x1d8] sm:$0xff]  ;;  %v959_v22 = vpack.c.bf16 %v109_v14, %v105_v13 }
  0x3b   :  { %v120_v21 = vld [vmem:[#allocation2 + $0x1f8] sm:$0xff]  ;;  %v1023_v23 = vpack.c.bf16 %v111_v17, %v107_v15  ;;  %v961_v24 = vpack.c.bf16 %v118_v19, %v114_v18  ;;  %v113_v25 = vld [vmem:[#allocation2 + $0x1c0] sm:$0xff]  ;;  %v115_v27 = vld [vmem:[#allocation2 + $0x1d0] sm:$0xff] }
  0x3c   :  { %952 = vmatpush1.bf16.msra.mxu0 %v951_v62  ;;  %v117_v26 = vld [vmem:[#allocation2 + $0x1e0] sm:$0xff]  ;;  %v1025_v28 = vpack.c.bf16 %v120_v21, %v116_v20  ;;  %v119_v29 = vld [vmem:[#allocation2 + $0x1f0] sm:$0xff]  ;;  %v122_v30 = vld [vmem:[#allocation2 + $0x208] sm:$0xff] }
  0x3d   :  { %1016 = vmatpush1.bf16.msra.mxu1 %v1015_v63  ;;  %954 = vmatprep.subr.bf16.mxu0 %v953_v0  ;;  %v126_v31 = vld [vmem:[#allocation2 + $0x228] sm:$0xff]  ;;  %v124_v32 = vld [vmem:[#allocation2 + $0x218] sm:$0xff]  ;;  %v963_v34 = vpack.c.bf16 %v117_v26, %v113_v25  ;;  %v1027_v35 = vpack.c.bf16 %v119_v29, %v115_v27  ;;  %v121_v37 = vld [vmem:[#allocation2 + $0x200] sm:$0xff] }
  0x3e   :  { %1018 = vmatprep.subr.bf16.mxu1 %v1017_v4  ;;  %v128_v33 = vld [vmem:[#allocation2 + $0x238] sm:$0xff]  ;;  %v965_v36 = vpack.c.bf16 %v126_v31, %v122_v30  ;;  %v125_v38 = vld [vmem:[#allocation2 + $0x220] sm:$0xff]  ;;  %v123_v39 = vld [vmem:[#allocation2 + $0x210] sm:$0xff] }
  0x3f   :  { %v1029_v40 = vpack.c.bf16 %v128_v33, %v124_v32  ;;  %v127_v41 = vld [vmem:[#allocation2 + $0x230] sm:$0xff]  ;;  %v130_v42 = vld [vmem:[#allocation2 + $0x248] sm:$0xff]  ;;  %v132_v44 = vld [vmem:[#allocation2 + $0x258] sm:$0xff]  ;;  %v967_v46 = vpack.c.bf16 %v125_v38, %v121_v37 }
  0x40   :  { %956 = vmatpush1.bf16.msra.mxu0 %v955_v10  ;;  %v134_v43 = vld [vmem:[#allocation2 + $0x268] sm:$0xff]  ;;  %v136_v45 = vld [vmem:[#allocation2 + $0x278] sm:$0xff]  ;;  %v1031_v47 = vpack.c.bf16 %v127_v41, %v123_v39  ;;  %v129_v49 = vld [vmem:[#allocation2 + $0x240] sm:$0xff] }
  0x41   :  { %1020 = vmatpush1.bf16.msra.mxu1 %v1019_v11  ;;  %958 = vmatprep.subr.bf16.mxu0 %v957_v12  ;;  %v969_v48 = vpack.c.bf16 %v134_v43, %v130_v42  ;;  %v133_v50 = vld [vmem:[#allocation2 + $0x260] sm:$0xff]  ;;  %v131_v51 = vld [vmem:[#allocation2 + $0x250] sm:$0xff]  ;;  %v1033_v52 = vpack.c.bf16 %v136_v45, %v132_v44  ;;  %v138_v54 = vld [vmem:[#allocation2 + $0x288] sm:$0xff] }
  0x42   :  { %1022 = vmatprep.subr.bf16.mxu1 %v1021_v16  ;;  %v135_v53 = vld [vmem:[#allocation2 + $0x270] sm:$0xff]  ;;  %v142_v55 = vld [vmem:[#allocation2 + $0x2a8] sm:$0xff]  ;;  %v140_v56 = vld [vmem:[#allocation2 + $0x298] sm:$0xff]  ;;  %v971_v58 = vpack.c.bf16 %v133_v50, %v129_v49 }
  0x43   :  { %v144_v57 = vld [vmem:[#allocation2 + $0x2b8] sm:$0xff]  ;;  %v1035_v59 = vpack.c.bf16 %v135_v53, %v131_v51  ;;  %v973_v60 = vpack.c.bf16 %v142_v55, %v138_v54  ;;  %v137_v61 = vld [vmem:[#allocation2 + $0x280] sm:$0xff]  ;;  %v139_v63 = vld [vmem:[#allocation2 + $0x290] sm:$0xff] }
  0x44   :  { %960 = vmatpush1.bf16.msra.mxu0 %v959_v22  ;;  %v141_v62 = vld [vmem:[#allocation2 + $0x2a0] sm:$0xff]  ;;  %v1037_v0 = vpack.c.bf16 %v144_v57, %v140_v56  ;;  %v143_v1 = vld [vmem:[#allocation2 + $0x2b0] sm:$0xff]  ;;  %v146_v2 = vld [vmem:[#allocation2 + $0x2c8] sm:$0xff] }
  0x45   :  { %1024 = vmatpush1.bf16.msra.mxu1 %v1023_v23  ;;  %962 = vmatprep.subr.bf16.mxu0 %v961_v24  ;;  %v150_v3 = vld [vmem:[#allocation2 + $0x2e8] sm:$0xff]  ;;  %v148_v4 = vld [vmem:[#allocation2 + $0x2d8] sm:$0xff]  ;;  %v975_v6 = vpack.c.bf16 %v141_v62, %v137_v61  ;;  %v145_v7 = vld [vmem:[#allocation2 + $0x2c0] sm:$0xff]  ;;  %v1039_v8 = vpack.c.bf16 %v143_v1, %v139_v63 }
  0x46   :  { %1026 = vmatprep.subr.bf16.mxu1 %v1025_v28  ;;  %v152_v5 = vld [vmem:[#allocation2 + $0x2f8] sm:$0xff]  ;;  %v977_v9 = vpack.c.bf16 %v150_v3, %v146_v2  ;;  %v149_v10 = vld [vmem:[#allocation2 + $0x2e0] sm:$0xff]  ;;  %v147_v11 = vld [vmem:[#allocation2 + $0x2d0] sm:$0xff]  ;;  %v1298_v2 = vmov 0.0  }
  0x47   :  { %v151_v12 = vld [vmem:[#allocation2 + $0x2f0] sm:$0xff]  ;;  %v1041_v13 = vpack.c.bf16 %v152_v5, %v148_v4  ;;  %v154_v14 = vld [vmem:[#allocation2 + $0x308] sm:$0xff]  ;;  %v156_v17 = vld [vmem:[#allocation2 + $0x318] sm:$0xff]  ;;  %v979_v19 = vpack.c.bf16 %v149_v10, %v145_v7 }
  0x48   :  { %964 = vmatpush1.bf16.msra.mxu0 %v963_v34  ;;  %v158_v15 = vld [vmem:[#allocation2 + $0x328] sm:$0xff]  ;;  %v160_v18 = vld [vmem:[#allocation2 + $0x338] sm:$0xff]  ;;  %v1043_v20 = vpack.c.bf16 %v151_v12, %v147_v11  ;;  %v153_v22 = vld [vmem:[#allocation2 + $0x300] sm:$0xff] }
  0x49   :  { %1028 = vmatpush1.bf16.msra.mxu1 %v1027_v35  ;;  %966 = vmatprep.subr.bf16.mxu0 %v965_v36  ;;  %v56_v16 = vld [vmem:[%s1439_s0 + $0x8] sm:$0xff]  ;;  %v981_v21 = vpack.c.bf16 %v158_v15, %v154_v14  ;;  %v157_v23 = vld [vmem:[#allocation2 + $0x320] sm:$0xff]  ;;  %v155_v24 = vld [vmem:[#allocation2 + $0x310] sm:$0xff]  ;;  %v1045_v25 = vpack.c.bf16 %v160_v18, %v156_v17 }
  0x4a   :  { %1030 = vmatprep.subr.bf16.mxu1 %v1029_v40  ;;  %249 = vmatprep.mubr.f32.mxu0 %v56_v16  ;;  %v159_v26 = vld [vmem:[#allocation2 + $0x330] sm:$0xff]  ;;  %v162_v27 = vld [vmem:[#allocation2 + $0x348] sm:$0xff]  ;;  %v164_v29 = vld [vmem:[#allocation2 + $0x358] sm:$0xff]  ;;  %v983_v31 = vpack.c.bf16 %v157_v23, %v153_v22 }
  0x4b   :  { %320 = vmatprep.mubr.f32.mxu1 %v56_v16  ;;  %v166_v28 = vld [vmem:[#allocation2 + $0x368] sm:$0xff]  ;;  %v168_v30 = vld [vmem:[#allocation2 + $0x378] sm:$0xff]  ;;  %v1047_v32 = vpack.c.bf16 %v159_v26, %v155_v24  ;;  %v161_v34 = vld [vmem:[#allocation2 + $0x340] sm:$0xff]  ;;  %v1299_v26 = vmov 0  }
  0x4c   :  { %968 = vmatpush1.bf16.msra.mxu0 %v967_v46  ;;  %v985_v33 = vpack.c.bf16 %v166_v28, %v162_v27  ;;  %v165_v35 = vld [vmem:[#allocation2 + $0x360] sm:$0xff]  ;;  %v163_v36 = vld [vmem:[#allocation2 + $0x350] sm:$0xff]  ;;  %v1049_v37 = vpack.c.bf16 %v168_v30, %v164_v29  ;;  %v170_v39 = vld [vmem:[#allocation2 + $0x388] sm:$0xff]  ;;  %1215 = vset.pattern.permute.xlu1 %v1299_v26 }
  0x4d   :  { %1032 = vmatpush1.bf16.msra.mxu1 %v1031_v47  ;;  %970 = vmatprep.subr.bf16.mxu0 %v969_v48  ;;  %v167_v38 = vld [vmem:[#allocation2 + $0x370] sm:$0xff]  ;;  %v174_v40 = vld [vmem:[#allocation2 + $0x3a8] sm:$0xff]  ;;  %v172_v41 = vld [vmem:[#allocation2 + $0x398] sm:$0xff]  ;;  %v987_v43 = vpack.c.bf16 %v165_v35, %v161_v34 }
  0x4e   :  { %1034 = vmatprep.subr.bf16.mxu1 %v1033_v52  ;;  %v176_v42 = vld [vmem:[#allocation2 + $0x3b8] sm:$0xff]  ;;  %v1051_v44 = vpack.c.bf16 %v167_v38, %v163_v36  ;;  %v989_v45 = vpack.c.bf16 %v174_v40, %v170_v39  ;;  %v169_v46 = vld [vmem:[#allocation2 + $0x380] sm:$0xff]  ;;  %v171_v48 = vld [vmem:[#allocation2 + $0x390] sm:$0xff]  ;;  %1214 = vset.pattern.permute.xlu0 %v1299_v26 }
  0x4f   :  { %v173_v47 = vld [vmem:[#allocation2 + $0x3a0] sm:$0xff]  ;;  %v1053_v49 = vpack.c.bf16 %v176_v42, %v172_v41  ;;  %v175_v50 = vld [vmem:[#allocation2 + $0x3b0] sm:$0xff]  ;;  %v178_v51 = vld [vmem:[#allocation2 + $0x3c8] sm:$0xff] }
  0x50   :  { %972 = vmatpush1.bf16.msra.mxu0 %v971_v58  ;;  %v182_v52 = vld [vmem:[#allocation2 + $0x3e8] sm:$0xff]  ;;  %v180_v53 = vld [vmem:[#allocation2 + $0x3d8] sm:$0xff]  ;;  %v991_v55 = vpack.c.bf16 %v173_v47, %v169_v46  ;;  %v1055_v56 = vpack.c.bf16 %v175_v50, %v171_v48  ;;  %v177_v58 = vld [vmem:[#allocation2 + $0x3c0] sm:$0xff] }
  0x51   :  { %1036 = vmatpush1.bf16.msra.mxu1 %v1035_v59  ;;  %974 = vmatprep.subr.bf16.mxu0 %v973_v60  ;;  %v184_v54 = vld [vmem:[#allocation2 + $0x3f8] sm:$0xff]  ;;  %v993_v57 = vpack.c.bf16 %v182_v52, %v178_v51  ;;  %v181_v59 = vld [vmem:[#allocation2 + $0x3e0] sm:$0xff]  ;;  %v179_v61 = vld [vmem:[#allocation2 + $0x3d0] sm:$0xff] }
  0x52   :  { %1038 = vmatprep.subr.bf16.mxu1 %v1037_v0  ;;  %v1057_v60 = vpack.c.bf16 %v184_v54, %v180_v53  ;;  %v183_v62 = vld [vmem:[#allocation2 + $0x3f0] sm:$0xff]  ;;  %v995_v63 = vpack.c.bf16 %v181_v59, %v177_v58  ;;  %v55_v1 = vld [vmem:[%s1439_s0] sm:$0xff]  ;;  %v328_v10 = vld [vmem:[%s1442_s3 + $0x8] sm:$0xff] }
  0x53   :  { %v1059_v0 = vpack.c.bf16 %v183_v62, %v179_v61  ;;  %v413_v17 = vld [vmem:[%s1443_s4] sm:$0xff]  ;;  %v414_v18 = vld [vmem:[%s1443_s4 + $0x8] sm:$0xff]  ;;  %v642_v42 = vld [vmem:[#allocation5 + $0x18] sm:$0xff] }
  0x54   :  { %976 = vmatpush1.bf16.msra.mxu0 %v975_v6  ;;  %v619_v27 = vld [vmem:[%s1445_s6] sm:$0xff]  ;;  %v640_v41 = vld [vmem:[#allocation5 + $0x8] sm:$0xff]  ;;  %v646_v48 = vld [vmem:[#allocation5 + $0x38] sm:$0xff] }
  0x55   :  { %1040 = vmatpush1.bf16.msra.mxu1 %v1039_v8  ;;  %978 = vmatprep.subr.bf16.mxu0 %v977_v9  ;;  %v327_v9 = vld [vmem:[%s1442_s3] sm:$0xff]  ;;  %v644_v46 = vld [vmem:[#allocation5 + $0x28] sm:$0xff]  ;;  %v706_v50 = vld [vmem:[#allocation5 + $0x218] sm:$0xff] }
  0x56   :  { %1042 = vmatprep.subr.bf16.mxu1 %v1041_v13  ;;  %v603_v40 = vld [vmem:[%s1444_s5] sm:$0xff]  ;;  %v1077_v51 = vpack.c.bf16 %v646_v48, %v644_v46  ;;  %v645_v54 = vld [vmem:[#allocation5 + $0x30] sm:$0xff]  ;;  %v648_v58 = vld [vmem:[#allocation5 + $0x48] sm:$0xff] }
  0x57   :  { %v643_v53 = vld [vmem:[#allocation5 + $0x20] sm:$0xff]  ;;  %v650_v59 = vld [vmem:[#allocation5 + $0x58] sm:$0xff]  ;;  %v708_v62 = vld [vmem:[#allocation5 + $0x228] sm:$0xff] }
  0x58   :  { %980 = vmatpush1.bf16.msra.mxu0 %v979_v19  ;;  %v1081_v61 = vpack.c.bf16 %v650_v59, %v648_v58  ;;  %v717_v26 = vld [vmem:[#allocation5 + $0x270] sm:$0xff]  ;;  %v726_v46 = vld [vmem:[#allocation5 + $0x2b8] sm:$0xff]  ;;  %v668_v59 = vld [vmem:[#allocation5 + $0xe8] sm:$0xff] }
  0x59   :  { %1044 = vmatpush1.bf16.msra.mxu1 %v1043_v20  ;;  %982 = vmatprep.subr.bf16.mxu0 %v981_v21  ;;  %v666_v48 = vld [vmem:[#allocation5 + $0xd8] sm:$0xff] }
  0x5a   :  { %1046 = vmatprep.subr.bf16.mxu1 %v1045_v25  ;;  %v604_v25 = vld [vmem:[%s1444_s5 + $0x8] sm:$0xff]  ;;  %v730_v58 = vld [vmem:[#allocation5 + $0x2d8] sm:$0xff] }
  0x5b   :  { %612 = vperm.xlu1 %1215, %v604_v25   ;;  %v715_v25 = vld [vmem:[#allocation5 + $0x260] sm:$0xff] }
  0x5c   :  { %984 = vmatpush1.bf16.msra.mxu0 %v983_v31 }
  0x5d   :  { %1048 = vmatpush1.bf16.msra.mxu1 %v1047_v32  ;;  %986 = vmatprep.subr.bf16.mxu0 %v985_v33 }
  0x5e   :  { %1050 = vmatprep.subr.bf16.mxu1 %v1049_v37 }
  0x5f   :  { %623 = vperm.xlu1 %1215, %v619_v27  }
  0x60   :  { %988 = vmatpush1.bf16.msra.mxu0 %v987_v43  ;;  %v1073_v43 = vpack.c.bf16 %v642_v42, %v640_v41  ;;  %v719_v41 = vld [vmem:[#allocation5 + $0x280] sm:$0xff]  ;;  %v721_v42 = vld [vmem:[#allocation5 + $0x290] sm:$0xff] }
  0x61   :  { %1052 = vmatpush1.bf16.msra.mxu1 %v1051_v44  ;;  %990 = vmatprep.subr.bf16.mxu0 %v989_v45  ;;  %v639_v44 = vld [vmem:[#allocation5] sm:$0xff]  ;;  %v641_v45 = vld [vmem:[#allocation5 + $0x10] sm:$0xff] }
  0x62   :  { %1054 = vmatprep.subr.bf16.mxu1 %v1053_v49  ;;  %v1075_v47 = vpack.c.bf16 %v641_v45, %v639_v44  ;;  %v704_v49 = vld [vmem:[#allocation5 + $0x208] sm:$0xff]  ;;  %v661_v44 = vld [vmem:[#allocation5 + $0xb0] sm:$0xff] }
  0x63   :  { %v1137_v52 = vpack.c.bf16 %v706_v50, %v704_v49  ;;  %v724_v45 = vld [vmem:[#allocation5 + $0x2a8] sm:$0xff]  ;;  %v1155_v49 = vpack.c.bf16 %v721_v42, %v719_v41  ;;  %v741_v41 = vld [vmem:[#allocation5 + $0x330] sm:$0xff] }
  0x64   :  { %992 = vmatpush1.bf16.msra.mxu0 %v991_v55  ;;  %v703_v55 = vld [vmem:[#allocation5 + $0x200] sm:$0xff] }
  0x65   :  { %1056 = vmatpush1.bf16.msra.mxu1 %v1055_v56  ;;  %994 = vmatprep.subr.bf16.mxu0 %v993_v57  ;;  %v1079_v56 = vpack.c.bf16 %v645_v54, %v643_v53  ;;  %v705_v57 = vld [vmem:[#allocation5 + $0x210] sm:$0xff]  ;;  %v723_v53 = vld [vmem:[#allocation5 + $0x2a0] sm:$0xff] }
  0x66   :  { %1058 = vmatprep.subr.bf16.mxu1 %v1057_v60  ;;  %v1139_v60 = vpack.c.bf16 %v705_v57, %v703_v55  ;;  %v725_v54 = vld [vmem:[#allocation5 + $0x2b0] sm:$0xff]  ;;  %v728_v57 = vld [vmem:[#allocation5 + $0x2c8] sm:$0xff] }
  0x68   :  { %996 = vmatpush1.bf16.msra.mxu0 %v995_v63  ;;  %v710_v63 = vld [vmem:[#allocation5 + $0x238] sm:$0xff] }
  0x69   :  { %1060 = vmatpush1.bf16.msra.mxu1 %v1059_v0  ;;  %v647_v0 = vld [vmem:[#allocation5 + $0x40] sm:$0xff] }
  0x6b   :  { %250 = vmatmul.mubr.f32.vlgmr.msra.gmra.mrb[0].mxu0 %v55_v1 }
  0x6c   :  { %321 = vmatmul.mubr.f32.vlgmr.msra.gmra.mrb[0].mxu1 %v55_v1  ;;  %400 = vmatprep.mubr.f32.mxu0 %v1298_v2  ;;  %v1141_v1 = vpack.c.bf16 %v710_v63, %v708_v62  ;;  %v1161_v63 = vpack.c.bf16 %v730_v58, %v728_v57  ;;  %v746_v57 = vld [vmem:[#allocation5 + $0x358] sm:$0xff]  ;;  %v683_v58 = vld [vmem:[#allocation5 + $0x160] sm:$0xff] }
  0x6d   :  { %406 = vmatprep.mubr.f32.mxu1 %v1298_v2 }
 0x13e   :  { %v251_v3 = vpop.f32.mrb[0].mxu0 }
 0x13f   :  { %v322_v4 = vpop.f32.mrb[0].mxu1  ;;  %v253_v5 = vpop.f32.mrb[1].mxu0 }
 0x140   :  { %v1063_v6 = vpack.c.bf16 %v322_v4, %v251_v3  ;;  %v324_v7 = vpop.f32.mrb[1].mxu1  ;;  %v707_v3 = vld [vmem:[#allocation5 + $0x220] sm:$0xff]  ;;  %v709_v4 = vld [vmem:[#allocation5 + $0x230] sm:$0xff] }
 0x141   :  { %v1061_v8 = vpack.c.bf16 %v324_v7, %v253_v5  ;;  %v1143_v5 = vpack.c.bf16 %v709_v4, %v707_v3  ;;  %v654_v7 = vld [vmem:[#allocation5 + $0x78] sm:$0xff]  ;;  %v669_v4 = vld [vmem:[#allocation5 + $0xf0] sm:$0xff] }
 0x143   :  { %1062 = vmatprep.subr.bf16.mxu0 %v1061_v8  ;;  %1201 = vmatprep.subr.bf16.mxu1 %v1061_v8  ;;  %v712_v8 = vld [vmem:[#allocation5 + $0x248] sm:$0xff] }
 0x144   :  { %1064 = vmatpush1.bf16.msra.mxu0 %v1063_v6  ;;  %1202 = vmatpush1.bf16.msra.mxu1 %v1063_v6  ;;  %v652_v6 = vld [vmem:[#allocation5 + $0x68] sm:$0xff] }
 0x147   :  { %927 = vmatmul.mubr.msk.f32.vlgmr.msra.gmra.mrb[2].mxu0 %vm329_vm0, %v327_v9  ;;  %928 = vmatmul.mubr.msk.f32.vlgmr.msra.gmra.mrb[2].mxu1 %vm329_vm0, %v328_v10  ;;  %v714_v10 = vld [vmem:[#allocation5 + $0x258] sm:$0xff] }
 0x148   :  { %485 = vmatprep.mubr.f32.mxu1 %v1298_v2  ;;  %576 = vmatprep.mubr.f32.mxu0 %v1298_v2 }
 0x21a   :  { %v402_v11 = vpop.f32.mrb[2].mxu0  ;;  %v408_v12 = vpop.f32.mrb[2].mxu1 }
 0x21b   :  { %v1067_v13 = vpack.c.bf16 %v408_v12, %v402_v11  ;;  %v404_v14 = vpop.f32.mrb[3].mxu0  ;;  %v410_v15 = vpop.f32.mrb[3].mxu1 }
 0x21c   :  { %v1065_v16 = vpack.c.bf16 %v410_v15, %v404_v14 }
 0x21e   :  { %1066 = vmatprep.subr.bf16.mxu1 %v1065_v16  ;;  %v713_v16 = vld [vmem:[#allocation5 + $0x250] sm:$0xff] }
 0x21f   :  { %1068 = vmatpush1.bf16.msra.mxu1 %v1067_v13  ;;  %v1085_v13 = vpack.c.bf16 %v654_v7, %v652_v6  ;;  %v734_v6 = vld [vmem:[#allocation5 + $0x2f8] sm:$0xff]  ;;  %v672_v7 = vld [vmem:[#allocation5 + $0x108] sm:$0xff] }
 0x220   :  { %1138 = vmatprep.subr.bf16.mxu1 %v1137_v52  ;;  %v663_v52 = vld [vmem:[#allocation5 + $0xc0] sm:$0xff] }
 0x222   :  { %929 = vmatmul.mubr.msk.f32.vlgmr.msra.gmra.mrb[4].mxu1 %vm329_vm0, %v413_v17 }
 0x223   :  { %491 = vmatprep.mubr.f32.mxu1 %v1298_v2  ;;  %1140 = vmatpush1.bf16.msra.mxu1 %v1139_v60  ;;  %v670_v60 = vld [vmem:[#allocation5 + $0xf8] sm:$0xff] }
 0x224   :  { %1142 = vmatprep.subr.bf16.mxu1 %v1141_v1  ;;  %v727_v1 = vld [vmem:[#allocation5 + $0x2c0] sm:$0xff]  ;;  %v1101_v3 = vpack.c.bf16 %v670_v60, %v668_v59  ;;  %v685_v59 = vld [vmem:[#allocation5 + $0x170] sm:$0xff] }
 0x226   :  { %930 = vmatmul.mubr.msk.f32.gmra.mrb[6].mxu1 %vm329_vm0, %v414_v18 }
 0x227   :  { %1144 = vmatpush1.bf16.msra.mxu1 %v1143_v5  ;;  %v732_v5 = vld [vmem:[#allocation5 + $0x2e8] sm:$0xff] }
 0x2f5   :  { %v487_v19 = vpop.f32.mrb[4].mxu1 }
 0x2f6   :  { %v489_v20 = vpop.f32.mrb[5].mxu1 }
 0x2f7   :  { %v498_v21 = vadd.f32 %v489_v20, %v487_v19  ;;  %v716_v19 = vld [vmem:[#allocation5 + $0x268] sm:$0xff]  ;;  %v718_v20 = vld [vmem:[#allocation5 + $0x278] sm:$0xff] }
 0x2f9   :  { %499 = vadd.xlane.f32.xlu0 %v498_v21  ;;  %v493_v22 = vpop.f32.mrb[6].mxu1 }
 0x2fa   :  { %v495_v23 = vpop.f32.mrb[7].mxu1 }
 0x2fb   :  { %v501_v24 = vadd.f32 %v495_v23, %v493_v22  ;;  %v1149_v23 = vpack.c.bf16 %v718_v20, %v716_v19  ;;  %v676_v19 = vld [vmem:[#allocation5 + $0x128] sm:$0xff]  ;;  %v678_v20 = vld [vmem:[#allocation5 + $0x138] sm:$0xff] }
 0x2fd   :  { %502 = vadd.xlane.f32.xlu0 %v501_v24  ;;  %v655_v24 = vld [vmem:[#allocation5 + $0x80] sm:$0xff] }
 0x313   :  { %607 = vperm.xlu0 %1214, %v603_v40   ;;  %v659_v40 = vld [vmem:[#allocation5 + $0xa0] sm:$0xff] }
 0x314   :  { %v1095_v50 = vpack.c.bf16 %v661_v44, %v659_v40  ;;  %v739_v40 = vld [vmem:[#allocation5 + $0x320] sm:$0xff]  ;;  %v681_v44 = vld [vmem:[#allocation5 + $0x150] sm:$0xff] }
 0x386   :  { %v500_v28 = vpop.xlane.xlu0 %499 }
 0x387   :  { %v1398_v29 = vsub.f32 %v402_v11, %v500_v28  ;;  %v1400_v30 = vsub.f32 %v404_v14, %v500_v28  ;;  %v651_v11 = vld [vmem:[#allocation5 + $0x60] sm:$0xff]  ;;  %v1145_v14 = vpack.c.bf16 %v714_v10, %v712_v8  ;;  %v657_v28 = vld [vmem:[#allocation5 + $0x90] sm:$0xff]  ;;  %v674_v8 = vld [vmem:[#allocation5 + $0x118] sm:$0xff] }
 0x389   :  { %v508_v34 = vmul.f32 %v1398_v29, %v1398_v29  ;;  %v509_v35 = vmul.f32 %v1400_v30, %v1400_v30  ;;  %1146 = vmatprep.subr.bf16.mxu1 %v1145_v14  ;;  %v733_v14 = vld [vmem:[#allocation5 + $0x2f0] sm:$0xff] }
 0x38a   :  { %v503_v31 = vpop.xlane.xlu0 %502 }
 0x38b   :  { %v1402_v32 = vsub.f32 %v408_v12, %v503_v31  ;;  %v1404_v33 = vsub.f32 %v410_v15, %v503_v31  ;;  %v653_v12 = vld [vmem:[#allocation5 + $0x70] sm:$0xff]  ;;  %v711_v15 = vld [vmem:[#allocation5 + $0x240] sm:$0xff]  ;;  %v720_v31 = vld [vmem:[#allocation5 + $0x288] sm:$0xff] }
 0x38c   :  { %v1147_v21 = vpack.c.bf16 %v713_v16, %v711_v15  ;;  %v1087_v22 = vpack.c.bf16 %v653_v12, %v651_v11  ;;  %v1165_v11 = vpack.c.bf16 %v734_v6, %v732_v5  ;;  %v671_v12 = vld [vmem:[#allocation5 + $0x100] sm:$0xff]  ;;  %v1105_v15 = vpack.c.bf16 %v674_v8, %v672_v7  ;;  %v673_v16 = vld [vmem:[#allocation5 + $0x110] sm:$0xff]  ;;  %v750_v6 = vld [vmem:[#allocation5 + $0x378] sm:$0xff] }
 0x38d   :  { %v510_v36 = vmul.f32 %v1402_v32, %v1402_v32  ;;  %v511_v37 = vmul.f32 %v1404_v33, %v1404_v33  ;;  %v687_v7 = vld [vmem:[#allocation5 + $0x180] sm:$0xff]  ;;  %v689_v8 = vld [vmem:[#allocation5 + $0x190] sm:$0xff] }
 0x38e   :  { %1148 = vmatpush1.bf16.msra.mxu1 %v1147_v21 }
 0x38f   :  { %v1071_v38 = vpack.c.bf16 %v510_v36, %v508_v34  ;;  %v1069_v39 = vpack.c.bf16 %v511_v37, %v509_v35  ;;  %v722_v34 = vld [vmem:[#allocation5 + $0x298] sm:$0xff]  ;;  %v660_v35 = vld [vmem:[#allocation5 + $0xa8] sm:$0xff]  ;;  %v1151_v37 = vpack.c.bf16 %v717_v26, %v715_v25  ;;  %1150 = vmatprep.subr.bf16.mxu1 %v1149_v23  ;;  %v735_v25 = vld [vmem:[#allocation5 + $0x300] sm:$0xff] }
 0x390   :  { %v662_v36 = vld [vmem:[#allocation5 + $0xb8] sm:$0xff]  ;;  %v737_v26 = vld [vmem:[#allocation5 + $0x310] sm:$0xff] }
 0x391   :  { %1070 = vmatprep.subr.bf16.mxu0 %v1069_v39  ;;  %v1153_v39 = vpack.c.bf16 %v722_v34, %v720_v31  ;;  %v740_v31 = vld [vmem:[#allocation5 + $0x328] sm:$0xff]  ;;  %v742_v34 = vld [vmem:[#allocation5 + $0x338] sm:$0xff] }
 0x392   :  { %1072 = vmatpush1.bf16.msra.mxu0 %v1071_v38  ;;  %v1091_v38 = vpack.c.bf16 %v657_v28, %v655_v24  ;;  %1152 = vmatpush1.bf16.msra.mxu1 %v1151_v37  ;;  %v675_v24 = vld [vmem:[#allocation5 + $0x120] sm:$0xff]  ;;  %v677_v28 = vld [vmem:[#allocation5 + $0x130] sm:$0xff]  ;;  %v1171_v37 = vpack.c.bf16 %v737_v26, %v735_v25  ;;  %v696_v26 = vld [vmem:[#allocation5 + $0x1c8] sm:$0xff] }
 0x393   :  { %1074 = vmatprep.subr.bf16.mxu0 %v1073_v43  ;;  %v1093_v43 = vpack.c.bf16 %v662_v36, %v660_v35  ;;  %1154 = vmatprep.subr.bf16.mxu1 %v1153_v39  ;;  %v680_v35 = vld [vmem:[#allocation5 + $0x148] sm:$0xff]  ;;  %v682_v36 = vld [vmem:[#allocation5 + $0x158] sm:$0xff]  ;;  %v1173_v39 = vpack.c.bf16 %v742_v34, %v740_v31 }
 0x394   :  { %v1113_v42 = vpack.c.bf16 %v682_v36, %v680_v35  ;;  %v758_v34 = vld [vmem:[#allocation5 + $0x3b8] sm:$0xff]  ;;  %v695_v35 = vld [vmem:[#allocation5 + $0x1c0] sm:$0xff]  ;;  %v697_v36 = vld [vmem:[#allocation5 + $0x1d0] sm:$0xff] }
 0x395   :  { %931 = vmatmul.mubr.msk.f32.vlgmr.msra.gmra.mrb[4].mxu0 %vm329_vm0, %v413_v17  ;;  %v656_v17 = vld [vmem:[#allocation5 + $0x88] sm:$0xff] }
 0x396   :  { %582 = vmatprep.mubr.f32.mxu0 %v1298_v2  ;;  %1076 = vmatpush1.bf16.msra.mxu0 %v1075_v47  ;;  %v649_v2 = vld [vmem:[#allocation5 + $0x50] sm:$0xff]  ;;  %v664_v47 = vld [vmem:[#allocation5 + $0xc8] sm:$0xff] }
 0x397   :  { %1078 = vmatprep.subr.bf16.mxu0 %v1077_v51  ;;  %v1083_v9 = vpack.c.bf16 %v649_v2, %v647_v0  ;;  %v1157_v51 = vpack.c.bf16 %v726_v46, %v724_v45  ;;  %v1097_v55 = vpack.c.bf16 %v666_v48, %v664_v47  ;;  %1156 = vmatpush1.bf16.msra.mxu1 %v1155_v49  ;;  %v667_v0 = vld [vmem:[#allocation5 + $0xe0] sm:$0xff]  ;;  %v729_v2 = vld [vmem:[#allocation5 + $0x2d0] sm:$0xff] }
 0x398   :  { %v1103_v10 = vpack.c.bf16 %v669_v4, %v667_v0  ;;  %v1175_v45 = vpack.c.bf16 %v741_v41, %v739_v40  ;;  %v620_v0 = vld [vmem:[%s1445_s6 + $0x8] sm:$0xff]  ;;  %v757_v40 = vld [vmem:[#allocation5 + $0x3b0] sm:$0xff]  ;;  %s1300_s6 = smov [#allocation7]  }
 0x399   :  { %932 = vmatmul.mubr.msk.f32.gmra.mrb[6].mxu0 %vm329_vm0, %v414_v18  ;;  %v658_v18 = vld [vmem:[#allocation5 + $0x98] sm:$0xff]  ;;  %1158 = vmatprep.subr.bf16.mxu1 %v1157_v51  ;;  %v748_v4 = vld [vmem:[#allocation5 + $0x368] sm:$0xff]  ;;  %s917_s20 = sshll.u32 %s1300_s6, 4  ;;  %s918_s20 = int_to_ptr.vmem [resolvable:$true] %s917_s20 }
 0x39a   :  { %1080 = vmatpush1.bf16.msra.mxu0 %v1079_v56  ;;  %v1089_v27 = vpack.c.bf16 %v658_v18, %v656_v17  ;;  %v665_v56 = vld [vmem:[#allocation5 + $0xd0] sm:$0xff]  ;;  %v736_v17 = vld [vmem:[#allocation5 + $0x308] sm:$0xff]  ;;  %v738_v18 = vld [vmem:[#allocation5 + $0x318] sm:$0xff]  ;;  %s1264_s21 = scalar_lea.vmem %s918_s20, 256  ;;  %p1269_p3 = scmp.lt.s32.totalorder %s918_s20, %s918_s20 }
 0x39b   :  { %1082 = vmatprep.subr.bf16.mxu0 %v1081_v61  ;;  %v1159_v61 = vpack.c.bf16 %v725_v54, %v723_v53  ;;  %v1099_v62 = vpack.c.bf16 %v665_v56, %v663_v52  ;;  %v1169_v23 = vpack.c.bf16 %v738_v18, %v736_v17  ;;  %v684_v53 = vld [vmem:[#allocation5 + $0x168] sm:$0xff]  ;;  %v686_v54 = vld [vmem:[#allocation5 + $0x178] sm:$0xff]  ;;  %p1265_p2 = scmp.ne.s32.totalorder %s918_s20, %s1264_s21  ;;  %p1270_p4 = scmp.lt.s32.totalorder %s1264_s21, %s1264_s21 }
 0x39c   :  { %v1117_v56 = vpack.c.bf16 %v686_v54, %v684_v53  ;;  %v754_v18 = vld [vmem:[#allocation5 + $0x398] sm:$0xff]  ;;  %v764_v54 = vld [vmem:[#allocation5 + $0x3e8] sm:$0xff] }
 0x39d   :  { %1160 = vmatpush1.bf16.msra.mxu1 %v1159_v61  ;;  %v1119_v61 = vpack.c.bf16 %v685_v59, %v683_v58  ;;  %v765_v58 = vld [vmem:[#allocation5 + $0x3f0] sm:$0xff]  ;;  %p1271_p5 = por %p1270_p4, %p1269_p3 }
 0x39e   :  { %1084 = vmatpush1.bf16.msra.mxu0 %v1083_v9  ;;  %v1163_v9 = vpack.c.bf16 %v729_v2, %v727_v1  ;;  %1162 = vmatprep.subr.bf16.mxu1 %v1161_v63  ;;  %v745_v63 = vld [vmem:[#allocation5 + $0x350] sm:$0xff]  ;;  %v688_v2 = vld [vmem:[#allocation5 + $0x188] sm:$0xff] }
 0x39f   :  { %1086 = vmatprep.subr.bf16.mxu0 %v1085_v13  ;;  %v731_v13 = vld [vmem:[#allocation5 + $0x2e0] sm:$0xff]  ;;  %p1272_p6 = pnand %p1271_p5, %p1265_p2 }
 0x3a0   :  { %v1167_v21 = vpack.c.bf16 %v733_v14, %v731_v13  ;;  %v692_v14 = vld [vmem:[#allocation5 + $0x1a8] sm:$0xff] }
 0x3a1   :  { %1164 = vmatpush1.bf16.msra.mxu1 %v1163_v9  ;;  %v1181_v9 = vpack.c.bf16 %v750_v6, %v748_v4 }
 0x3a2   :  { %1088 = vmatpush1.bf16.msra.mxu0 %v1087_v22  ;;  %1166 = vmatprep.subr.bf16.mxu1 %v1165_v11  ;;  %v1107_v22 = vpack.c.bf16 %v673_v16, %v671_v12  ;;  %v747_v11 = vld [vmem:[#allocation5 + $0x360] sm:$0xff]  ;;  %v749_v12 = vld [vmem:[#allocation5 + $0x370] sm:$0xff]  ;;  %v752_v16 = vld [vmem:[#allocation5 + $0x388] sm:$0xff] }
 0x3a3   :  { %1090 = vmatprep.subr.bf16.mxu0 %v1089_v27  ;;  %v1109_v27 = vpack.c.bf16 %v678_v20, %v676_v19  ;;  %v1183_v13 = vpack.c.bf16 %v749_v12, %v747_v11  ;;  %v691_v19 = vld [vmem:[#allocation5 + $0x1a0] sm:$0xff]  ;;  %v693_v20 = vld [vmem:[#allocation5 + $0x1b0] sm:$0xff] }
 0x3a5   :  { %1168 = vmatpush1.bf16.msra.mxu1 %v1167_v21  ;;  %v1185_v21 = vpack.c.bf16 %v754_v18, %v752_v16 }
 0x3a6   :  { %1092 = vmatpush1.bf16.msra.mxu0 %v1091_v38  ;;  %1170 = vmatprep.subr.bf16.mxu1 %v1169_v23  ;;  %v1111_v38 = vpack.c.bf16 %v677_v28, %v675_v24  ;;  %v751_v23 = vld [vmem:[#allocation5 + $0x380] sm:$0xff]  ;;  %v753_v24 = vld [vmem:[#allocation5 + $0x390] sm:$0xff]  ;;  %v756_v28 = vld [vmem:[#allocation5 + $0x3a8] sm:$0xff] }
 0x3a7   :  { %1094 = vmatprep.subr.bf16.mxu0 %v1093_v43  ;;  %v679_v43 = vld [vmem:[#allocation5 + $0x140] sm:$0xff]  ;;  %v1187_v25 = vpack.c.bf16 %v753_v24, %v751_v23 }
 0x3a8   :  { %v1115_v46 = vpack.c.bf16 %v681_v44, %v679_v43  ;;  %v702_v43 = vld [vmem:[#allocation5 + $0x1f8] sm:$0xff]  ;;  %v760_v44 = vld [vmem:[#allocation5 + $0x3c8] sm:$0xff] }
 0x3a9   :  { %1172 = vmatpush1.bf16.msra.mxu1 %v1171_v37  ;;  %v1189_v37 = vpack.c.bf16 %v758_v34, %v756_v28 }
 0x3aa   :  { %1096 = vmatpush1.bf16.msra.mxu0 %v1095_v50  ;;  %1174 = vmatprep.subr.bf16.mxu1 %v1173_v39  ;;  %v755_v39 = vld [vmem:[#allocation5 + $0x3a0] sm:$0xff] }
 0x3ab   :  { %1098 = vmatprep.subr.bf16.mxu0 %v1097_v55  ;;  %v744_v55 = vld [vmem:[#allocation5 + $0x348] sm:$0xff]  ;;  %v1191_v41 = vpack.c.bf16 %v757_v40, %v755_v39 }
 0x3ac   :  { %v1177_v60 = vpack.c.bf16 %v746_v57, %v744_v55  ;;  %v766_v55 = vld [vmem:[#allocation5 + $0x3f8] sm:$0xff]  ;;  %v763_v57 = vld [vmem:[#allocation5 + $0x3e0] sm:$0xff] }
 0x3ad   :  { %1176 = vmatpush1.bf16.msra.mxu1 %v1175_v45  ;;  %v1199_v59 = vpack.c.bf16 %v765_v58, %v763_v57 }
 0x3ae   :  { %1100 = vmatpush1.bf16.msra.mxu0 %v1099_v62  ;;  %v743_v62 = vld [vmem:[#allocation5 + $0x340] sm:$0xff]  ;;  %1178 = vmatprep.subr.bf16.mxu1 %v1177_v60  ;;  %v613_v60 = vpop.permute.xlu1 %612 }
 0x3af   :  { %1102 = vmatprep.subr.bf16.mxu0 %v1101_v3  ;;  %v1179_v1 = vpack.c.bf16 %v745_v63, %v743_v62  ;;  %v690_v3 = vld [vmem:[#allocation5 + $0x198] sm:$0xff] }
 0x3b0   :  { %v1121_v5 = vpack.c.bf16 %v690_v3, %v688_v2  ;;  %v608_v3 = vpop.permute.xlu0 %607 }
 0x3b1   :  { %1180 = vmatpush1.bf16.msra.mxu1 %v1179_v1 }
 0x3b2   :  { %1104 = vmatpush1.bf16.msra.mxu0 %v1103_v10  ;;  %v1123_v10 = vpack.c.bf16 %v689_v8, %v687_v7  ;;  %1182 = vmatprep.subr.bf16.mxu1 %v1181_v9 }
 0x3b3   :  { %1106 = vmatprep.subr.bf16.mxu0 %v1105_v15  ;;  %v694_v15 = vld [vmem:[#allocation5 + $0x1b8] sm:$0xff] }
 0x3b4   :  { %v1125_v17 = vpack.c.bf16 %v694_v15, %v692_v14 }
 0x3b5   :  { %1184 = vmatpush1.bf16.msra.mxu1 %v1183_v13 }
 0x3b6   :  { %1108 = vmatpush1.bf16.msra.mxu0 %v1107_v22  ;;  %v1127_v22 = vpack.c.bf16 %v693_v20, %v691_v19  ;;  %1186 = vmatprep.subr.bf16.mxu1 %v1185_v21 }
 0x3b7   :  { %1110 = vmatprep.subr.bf16.mxu0 %v1109_v27  ;;  %v698_v27 = vld [vmem:[#allocation5 + $0x1d8] sm:$0xff] }
 0x3b8   :  { %v1129_v31 = vpack.c.bf16 %v698_v27, %v696_v26 }
 0x3b9   :  { %1188 = vmatpush1.bf16.msra.mxu1 %v1187_v25 }
 0x3ba   :  { %1112 = vmatpush1.bf16.msra.mxu0 %v1111_v38  ;;  %v1131_v38 = vpack.c.bf16 %v697_v36, %v695_v35  ;;  %1190 = vmatprep.subr.bf16.mxu1 %v1189_v37 }
 0x3bb   :  { %1114 = vmatprep.subr.bf16.mxu0 %v1113_v42  ;;  %v700_v42 = vld [vmem:[#allocation5 + $0x1e8] sm:$0xff] }
 0x3bc   :  { %v1133_v45 = vpack.c.bf16 %v702_v43, %v700_v42 }
 0x3bd   :  { %1192 = vmatpush1.bf16.msra.mxu1 %v1191_v41 }
 0x3be   :  { %1116 = vmatpush1.bf16.msra.mxu0 %v1115_v46  ;;  %v762_v46 = vld [vmem:[#allocation5 + $0x3d8] sm:$0xff] }
 0x3bf   :  { %1118 = vmatprep.subr.bf16.mxu0 %v1117_v56  ;;  %v1197_v56 = vpack.c.bf16 %v766_v55, %v764_v54 }
 0x3c2   :  { %1120 = vmatpush1.bf16.msra.mxu0 %v1119_v61  ;;  %v624_v61 = vpop.permute.xlu1 %623 }
 0x3c3   :  { %1122 = vmatprep.subr.bf16.mxu0 %v1121_v5 }
 0x3c6   :  { %1124 = vmatpush1.bf16.msra.mxu0 %v1123_v10 }
 0x3c7   :  { %1126 = vmatprep.subr.bf16.mxu0 %v1125_v17 }
 0x3ca   :  { %1128 = vmatpush1.bf16.msra.mxu0 %v1127_v22 }
 0x3cb   :  { %1130 = vmatprep.subr.bf16.mxu0 %v1129_v31 }
 0x3ce   :  { %1132 = vmatpush1.bf16.msra.mxu0 %v1131_v38 }
 0x3cf   :  { %1134 = vmatprep.subr.bf16.mxu0 %v1133_v45 }
 0x468   :  { %v578_v47 = vpop.f32.mrb[4].mxu0 }
 0x469   :  { %v580_v48 = vpop.f32.mrb[5].mxu0 }
 0x46a   :  { %v589_v49 = vadd.f32 %v580_v48, %v578_v47  ;;  %v699_v47 = vld [vmem:[#allocation5 + $0x1e0] sm:$0xff]  ;;  %v701_v48 = vld [vmem:[#allocation5 + $0x1f0] sm:$0xff] }
 0x46c   :  { %590 = vadd.xlane.f32.xlu1 %v589_v49  ;;  %v584_v50 = vpop.f32.mrb[6].mxu0  ;;  %v1193_v49 = vpack.c.bf16 %v762_v46, %v760_v44 }
 0x46d   :  { %v586_v51 = vpop.f32.mrb[7].mxu0 }
 0x46e   :  { %v592_v52 = vadd.f32 %v586_v51, %v584_v50  ;;  %v1135_v50 = vpack.c.bf16 %v701_v48, %v699_v47  ;;  %v759_v51 = vld [vmem:[#allocation5 + $0x3c0] sm:$0xff]  ;;  %1194 = vmatprep.subr.bf16.mxu1 %v1193_v49 }
 0x470   :  { %593 = vadd.xlane.f32.xlu1 %v592_v52  ;;  %v761_v52 = vld [vmem:[#allocation5 + $0x3d0] sm:$0xff]  ;;  %1136 = vmatpush1.bf16.msra.mxu0 %v1135_v50 }
 0x471   :  { %v1195_v53 = vpack.c.bf16 %v761_v52, %v759_v51 }
 0x473   :  { %1196 = vmatpush1.bf16.msra.mxu1 %v1195_v53 }
 0x474   :  { %1198 = vmatprep.subr.bf16.mxu1 %v1197_v56 }
 0x477   :  { %1200 = vmatpush1.bf16.msra.mxu1 %v1199_v59 }
 0x481   :  { %628 = vperm.xlu1 %1215, %v620_v0  }
 0x4f9   :  { %v591_v62 = vpop.xlane.xlu1 %590 }
 0x4fa   :  { %v595_v63 = vadd.f32 1e-05, %v591_v62 }
 0x4fc   :  { %1216 = vrsqrt.f32 %v595_v63 }
 0x4fd   :  { %v594_v0 = vpop.xlane.xlu1 %593 }
 0x4fe   :  { %v596_v1 = vadd.f32 1e-05, %v594_v0 }
 0x500   :  { %1218 = vrsqrt.f32 %v596_v1 }
 0x501   :  { %v629_v17 = vpop.permute.xlu1 %628 }
 0x506   :  { %v1217_v2 = vpop.eup %1216 }
 0x507   :  { %v599_v4 = vmul.f32 %v1217_v2, %v1398_v29  ;;  %v600_v5 = vmul.f32 %v1217_v2, %v1400_v30 }
 0x509   :  { %v615_v6 = vmul.f32 %v608_v3, %v599_v4  ;;  %v616_v7 = vmul.f32 %v608_v3, %v600_v5 }
 0x50a   :  { %v1219_v8 = vpop.eup %1218 }
 0x50b   :  { %v601_v9 = vmul.f32 %v1219_v8, %v1402_v32  ;;  %v602_v10 = vmul.f32 %v1219_v8, %v1404_v33  ;;  %v631_v11 = vadd.f32 %v624_v61, %v615_v6  ;;  %v632_v12 = vadd.f32 %v624_v61, %v616_v7 }
 0x50d   :  { %v617_v13 = vmul.f32 %v613_v60, %v601_v9  ;;  %v618_v14 = vmul.f32 %v613_v60, %v602_v10  ;;  %v635_v15 = vmax.f32 %v631_v11, 0.0  ;;  %v636_v16 = vmax.f32 %v632_v12, 0.0 }
 0x50f   :  { %v633_v18 = vadd.f32 %v629_v17, %v617_v13  ;;  %v634_v19 = vadd.f32 %v629_v17, %v618_v14  ;;  %831 = vmatprep.mubr.f32.mxu0 %v636_v16 }
 0x510   :  { %832 = vmatmul.mubr.f32.vlgmr.msra.gmra.mrb[8].mxu0 %v635_v15 }
 0x511   :  { %v637_v29 = vmax.f32 %v633_v18, 0.0  ;;  %v638_v30 = vmax.f32 %v634_v19, 0.0 }
 0x513   :  { %902 = vmatprep.mubr.f32.mxu1 %v638_v30 }
 0x514   :  { %903 = vmatmul.mubr.f32.vlgmr.msra.gmra.mrb[8].mxu1 %v637_v29 }
 0x5e3   :  { %v833_v20 = vpop.f32.mrb[8].mxu0 }
 0x5e4   :  { %v835_v21 = vpop.f32.mrb[9].mxu0 }
 0x5e7   :  { %v904_v32 = vpop.f32.mrb[8].mxu1 }
 0x5e8   :  { %v905_v33 = vadd.f32 %v904_v32, %v833_v20  ;;  %v906_v22 = vpop.f32.mrb[9].mxu1 }
 0x5e9   :  { %v907_v23 = vadd.f32 %v906_v22, %v835_v21 }
 0x5ea   :  { %909 = vst [vmem:[#allocation7] sm:$0xff] %v905_v33 }
 0x5eb   :  { %910 = vst [vmem:[#allocation7 + $0x8] sm:$0xff] %v907_v23 }
 0x5ec   :  { %1275 = shalt.err (!%p1272_p6)
}
 0x5ed   :  { %s1276_s24 = scalar_lea.hbm %s1446_s7, 256 }
 0x5ee   :  { %p1277_p7 = scmp.ne.s32.totalorder %s1446_s7, %s1276_s24  ;;  %p1280_p8 = scmp.lt.u32.totalorder %s1276_s24, %s1446_s7 }
 0x5f0   :  { %p1282_p9 = pnand %p1280_p8, %p1277_p7 }
 0x5f2   :  { %1285 = shalt.err (!%p1282_p9)
}
 0x5f3   :  { %920 = dma.vmem_to_hbm [thread:$0]  %s918_s20, 256, %s1446_s7, [#allocation4]  }
 0x5f4   :  { %1290 = dma.done.wait [#allocation4], 256  }
 0x5f5   :  { %1291 = vsyncadd [#allocation4], 4294967040 }
 0x5f6   :  { %924 = vsyncpa [#allocation3], 1 }
 0x5f7   :  { %925 = vsyncpa [#allocation6], 1 }
 0x5f8   :  { %926 = vsyncpa [#allocation4], 1 }

</bundles_post_ra>
